<compile_context>
chip_gen: v6e
topology: v6e:2x2x1
jax: 0.10.0
libtpu: 0.0.40
codegen_flags: <defaults>
</compile_context>

<pallas_src>
import functools

import jax
import jax.numpy as jnp
from jax.experimental import pallas as pl
from jax.experimental.pallas import tpu as pltpu


def _actor_kernel(x_ref, w1_ref, b1_ref, w2_ref, b2_ref, wh_ref, bh_ref,
                  mu_ref, sigma_ref, *, action_dim, sigma_min, sigma_max):
    """Fused Actor: fc1+ReLU -> fc2+ReLU -> fused {mu | clamped sigma} head."""
    x = x_ref[...]                                                    # [TB, S]

    # fc1 + ReLU  (f32 MXU accumulation; elementwise stays f32)
    h1 = jnp.dot(x, w1_ref[...], preferred_element_type=jnp.float32)
    h1 = jnp.maximum(h1 + b1_ref[...], 0.0)                           # [TB, H1]

    # fc2 + ReLU
    h2 = jnp.dot(h1, w2_ref[...], preferred_element_type=jnp.float32)
    h2 = jnp.maximum(h2 + b2_ref[...], 0.0)                           # [TB, H2]

    # fused heads: columns [:A] = mu, [A:] = sigma
    head = jnp.dot(h2, wh_ref[...], preferred_element_type=jnp.float32) + bh_ref[...]

    mu_ref[...] = head[:, :action_dim].astype(mu_ref.dtype)
    sigma_ref[...] = jnp.clip(head[:, action_dim:], sigma_min, sigma_max
                              ).astype(sigma_ref.dtype)


def _round_up(n: int, m: int) -> int:
    return ((n + m - 1) // m) * m


@jax.jit
def actor_forward(state, params):
    """state: [B, state_dim] -> (mu: [B, action_dim], sigma: [B, action_dim])."""
    w1, b1, w2, b2, wm, bm, ws, bs = params
    x = state.astype(jnp.float32)

    B, S = x.shape
    H1 = w1.shape[1]
    H2 = w2.shape[1]
    A = wm.shape[1]

    # Fuse the two heads into one weight matrix so the kernel runs a single
    # MXU matmul for both mu and sigma.
    wh = jnp.concatenate([wm, ws], axis=1)                 # [H2, 2A]
    bh = jnp.concatenate([bm, bs], axis=1)                 # [1, 2A]

    # Batch tiling: one block for small B; a "parallel" grid over batch tiles
    # for training-sized batches (weights pinned in VMEM via constant index_map).
    TILE_B = 256 if B > 256 else max(_round_up(B, 8), 8)
    Bp = _round_up(B, TILE_B)
    if Bp != B:
        x = jnp.pad(x, ((0, Bp - B), (0, 0)))
    grid = (Bp // TILE_B,)

    row_spec = lambda shape: pl.BlockSpec(shape, lambda i: (i, 0))   # batch-tiled
    pin_spec = lambda shape: pl.BlockSpec(shape, lambda i: (0, 0))   # VMEM-resident

    kernel = functools.partial(_actor_kernel, action_dim=A,
                               sigma_min=1e-6, sigma_max=1.0)

    mu, sigma = pl.pallas_call(
        kernel,
        out_shape=(jax.ShapeDtypeStruct((Bp, A), jnp.float32),
                   jax.ShapeDtypeStruct((Bp, A), jnp.float32)),
        grid=grid,
        in_specs=[
            row_spec((TILE_B, S)),
            pin_spec((S, H1)), pin_spec((1, H1)),
            pin_spec((H1, H2)), pin_spec((1, H2)),
            pin_spec((H2, 2 * A)), pin_spec((1, 2 * A)),
        ],
        out_specs=(row_spec((TILE_B, A)), row_spec((TILE_B, A))),
        compiler_params=pltpu.CompilerParams(dimension_semantics=("parallel",)),
    )(x, w1, b1, w2, b2, wh, bh)

    if Bp != B:
        mu, sigma = mu[:B], sigma[:B]
    return mu, sigma


def init_actor_params(key, state_dim, action_dim, hidden_dims):
    """PyTorch nn.Linear-style init (uniform +-1/sqrt(fan_in)).

    Weights stored transposed relative to nn.Linear ([in, out]); biases [1, out].
    Heads are (mu, sigma) in that order.
    """
    h1, h2 = hidden_dims
    dims = [(state_dim, h1), (h1, h2), (h2, action_dim), (h2, action_dim)]
    params = []
    for fan_in, fan_out in dims:
        key, kw, kb = jax.random.split(key, 3)
        bound = float(fan_in) ** -0.5
        w = jax.random.uniform(kw, (fan_in, fan_out), jnp.float32, -bound, bound)
        b = jax.random.uniform(kb, (1, fan_out), jnp.float32, -bound, bound)
        params.extend([w, b])
    return tuple(params)


def actor_reference(state, params, reparam_noise=1e-6):
    """Pure-JAX reference mirroring Actor.forward."""
    w1, b1, w2, b2, wm, bm, ws, bs = params
    h = jax.nn.relu(state @ w1 + b1)
    h = jax.nn.relu(h @ w2 + b2)
    mu = h @ wm + bm
    sigma = jnp.clip(h @ ws + bs, reparam_noise, 1.0)
    return mu, sigma


# TODO(synk): Actor.sample_normal (Normal rsample/log_prob, tanh squash, max_action
# scaling) is stochastic sampling logic outside forward(); left to plain JAX.

if __name__ == "__main__":
    key = jax.random.PRNGKey(0)

    batch = 8
    state_dim = 8
    action_dim = 4
    hidden_dims = (32, 32)
    # max_action only affects sample_normal (tanh squash + scale), not forward().

    key, ks, kp = jax.random.split(key, 3)
    state = jax.random.normal(ks, (batch, state_dim), jnp.float32)
    params = init_actor_params(kp, state_dim, action_dim, hidden_dims)

    mu, sigma = actor_forward(state, params)
    mu = jax.block_until_ready(mu)
    sigma = jax.block_until_ready(sigma)

    mu_ref, sigma_ref = actor_reference(state, params)
    assert mu.shape == (batch, action_dim), mu.shape
    assert sigma.shape == (batch, action_dim), sigma.shape
    assert jnp.allclose(mu, mu_ref, atol=1e-5, rtol=1e-5), (mu, mu_ref)
    assert jnp.allclose(sigma, sigma_ref, atol=1e-5, rtol=1e-5), (sigma, sigma_ref)
    assert bool(jnp.all(sigma >= 1e-6)) and bool(jnp.all(sigma <= 1.0))

    print("KERNEL_OK")
</pallas_src>

<mosaic_0001>
module attributes {stable_mosaic.version = 11 : i64} {
  func.func @_actor_kernel(%arg0: i32, %arg1: memref<8x8xf32, #tpu.memory_space<vmem>>, %arg2: memref<8x32xf32, #tpu.memory_space<vmem>>, %arg3: memref<1x32xf32, #tpu.memory_space<vmem>>, %arg4: memref<32x32xf32, #tpu.memory_space<vmem>>, %arg5: memref<1x32xf32, #tpu.memory_space<vmem>>, %arg6: memref<32x8xf32, #tpu.memory_space<vmem>>, %arg7: memref<1x8xf32, #tpu.memory_space<vmem>>, %arg8: memref<8x4xf32, #tpu.memory_space<vmem>>, %arg9: memref<8x4xf32, #tpu.memory_space<vmem>>) attributes {dimension_semantics = [#tpu.dimension_semantics<parallel>], iteration_bounds = array<i64: 1>, scalar_prefetch = 0 : i64, scratch_operands = 0 : i64, tpu.core_type = #tpu.core_type<tc>, window_params = [{transform_indices = @transform_0, window_bounds = array<i64: 8, 8>}, {pipeline_mode = #tpu.pipeline_mode<synchronous>, transform_indices = @transform_1, window_bounds = array<i64: 8, 32>}, {pipeline_mode = #tpu.pipeline_mode<synchronous>, transform_indices = @transform_2, window_bounds = array<i64: 1, 32>}, {pipeline_mode = #tpu.pipeline_mode<synchronous>, transform_indices = @transform_3, window_bounds = array<i64: 32, 32>}, {pipeline_mode = #tpu.pipeline_mode<synchronous>, transform_indices = @transform_4, window_bounds = array<i64: 1, 32>}, {pipeline_mode = #tpu.pipeline_mode<synchronous>, transform_indices = @transform_5, window_bounds = array<i64: 32, 8>}, {pipeline_mode = #tpu.pipeline_mode<synchronous>, transform_indices = @transform_6, window_bounds = array<i64: 1, 8>}, {transform_indices = @transform_7, window_bounds = array<i64: 8, 4>}, {transform_indices = @transform_8, window_bounds = array<i64: 8, 4>}]} {
    %c0 = arith.constant 0 : index
    %c0_0 = arith.constant 0 : index
    %0 = vector.load %arg1[%c0, %c0_0] : memref<8x8xf32, #tpu.memory_space<vmem>>, vector<8x8xf32>
    %c0_1 = arith.constant 0 : index
    %c0_2 = arith.constant 0 : index
    %1 = vector.load %arg2[%c0_1, %c0_2] : memref<8x32xf32, #tpu.memory_space<vmem>>, vector<8x32xf32>
    %cst = arith.constant dense<0.000000e+00> : vector<8x32xf32>
    %2 = tpu.matmul %0, %1, %cst {dimension_numbers = #tpu.dot_dimension_numbers<[1], [0], [0], [1], [0, 0, 1, 1], [], []>} : vector<8x8xf32>, vector<8x32xf32>, vector<8x32xf32> -> vector<8x32xf32>
    %c0_3 = arith.constant 0 : index
    %c0_4 = arith.constant 0 : index
    %3 = vector.load %arg3[%c0_3, %c0_4] : memref<1x32xf32, #tpu.memory_space<vmem>>, vector<1x32xf32>
    %4 = vector.broadcast %3 : vector<1x32xf32> to vector<8x32xf32>
    %5 = arith.addf %2, %4 : vector<8x32xf32>
    %cst_5 = arith.constant 0.000000e+00 : f32
    %6 = vector.broadcast %cst_5 : f32 to vector<8x32xf32>
    %7 = arith.maximumf %5, %6 : vector<8x32xf32>
    %c0_6 = arith.constant 0 : index
    %c0_7 = arith.constant 0 : index
    %8 = vector.load %arg4[%c0_6, %c0_7] : memref<32x32xf32, #tpu.memory_space<vmem>>, vector<32x32xf32>
    %cst_8 = arith.constant dense<0.000000e+00> : vector<8x32xf32>
    %9 = tpu.matmul %7, %8, %cst_8 {dimension_numbers = #tpu.dot_dimension_numbers<[1], [0], [0], [1], [0, 0, 1, 1], [], []>} : vector<8x32xf32>, vector<32x32xf32>, vector<8x32xf32> -> vector<8x32xf32>
    %c0_9 = arith.constant 0 : index
    %c0_10 = arith.constant 0 : index
    %10 = vector.load %arg5[%c0_9, %c0_10] : memref<1x32xf32, #tpu.memory_space<vmem>>, vector<1x32xf32>
    %11 = vector.broadcast %10 : vector<1x32xf32> to vector<8x32xf32>
    %12 = arith.addf %9, %11 : vector<8x32xf32>
    %cst_11 = arith.constant 0.000000e+00 : f32
    %13 = vector.broadcast %cst_11 : f32 to vector<8x32xf32>
    %14 = arith.maximumf %12, %13 : vector<8x32xf32>
    %c0_12 = arith.constant 0 : index
    %c0_13 = arith.constant 0 : index
    %15 = vector.load %arg6[%c0_12, %c0_13] : memref<32x8xf32, #tpu.memory_space<vmem>>, vector<32x8xf32>
    %cst_14 = arith.constant dense<0.000000e+00> : vector<8x8xf32>
    %16 = tpu.matmul %14, %15, %cst_14 {dimension_numbers = #tpu.dot_dimension_numbers<[1], [0], [0], [1], [0, 0, 1, 1], [], []>} : vector<8x32xf32>, vector<32x8xf32>, vector<8x8xf32> -> vector<8x8xf32>
    %c0_15 = arith.constant 0 : index
    %c0_16 = arith.constant 0 : index
    %17 = vector.load %arg7[%c0_15, %c0_16] : memref<1x8xf32, #tpu.memory_space<vmem>>, vector<1x8xf32>
    %18 = vector.broadcast %17 : vector<1x8xf32> to vector<8x8xf32>
    %19 = arith.addf %16, %18 : vector<8x8xf32>
    %20 = vector.extract_strided_slice %19 {offsets = [0, 0], sizes = [8, 4], strides = [1, 1]} : vector<8x8xf32> to vector<8x4xf32>
    %c0_17 = arith.constant 0 : index
    %c0_18 = arith.constant 0 : index
    %21 = vector.load %arg8[%c0_17, %c0_18] : memref<8x4xf32, #tpu.memory_space<vmem>>, vector<8x4xf32>
    tpu.vector_store %arg8[%c0_17, %c0_18], %20 {strides = array<i32>} : memref<8x4xf32, #tpu.memory_space<vmem>>, vector<8x4xf32>,
    %22 = vector.extract_strided_slice %19 {offsets = [0, 4], sizes = [8, 4], strides = [1, 1]} : vector<8x8xf32> to vector<8x4xf32>
    %cst_19 = arith.constant 9.99999997E-7 : f32
    %cst_20 = arith.constant 1.000000e+00 : f32
    %23 = vector.broadcast %cst_19 : f32 to vector<8x4xf32>
    %24 = arith.maximumf %23, %22 : vector<8x4xf32>
    %25 = vector.broadcast %cst_20 : f32 to vector<8x4xf32>
    %26 = arith.minimumf %25, %24 : vector<8x4xf32>
    %c0_21 = arith.constant 0 : index
    %c0_22 = arith.constant 0 : index
    %27 = vector.load %arg9[%c0_21, %c0_22] : memref<8x4xf32, #tpu.memory_space<vmem>>, vector<8x4xf32>
    tpu.vector_store %arg9[%c0_21, %c0_22], %26 {strides = array<i32>} : memref<8x4xf32, #tpu.memory_space<vmem>>, vector<8x4xf32>,
    return
  }
  func.func @transform_0(%arg0: i32) -> (i32, i32) {
    %c0_i32 = arith.constant 0 : i32
    %c0_i32_0 = arith.constant 0 : i32
    return %arg0, %c0_i32 : i32, i32
  }
  func.func @transform_1(%arg0: i32) -> (i32, i32) {
    %c0_i32 = arith.constant 0 : i32
    %c0_i32_0 = arith.constant 0 : i32
    %c0_i32_1 = arith.constant 0 : i32
    return %c0_i32, %c0_i32_0 : i32, i32
  }
  func.func @transform_2(%arg0: i32) -> (i32, i32) {
    %c0_i32 = arith.constant 0 : i32
    %c0_i32_0 = arith.constant 0 : i32
    %c0_i32_1 = arith.constant 0 : i32
    return %c0_i32, %c0_i32_0 : i32, i32
  }
  func.func @transform_3(%arg0: i32) -> (i32, i32) {
    %c0_i32 = arith.constant 0 : i32
    %c0_i32_0 = arith.constant 0 : i32
    %c0_i32_1 = arith.constant 0 : i32
    return %c0_i32, %c0_i32_0 : i32, i32
  }
  func.func @transform_4(%arg0: i32) -> (i32, i32) {
    %c0_i32 = arith.constant 0 : i32
    %c0_i32_0 = arith.constant 0 : i32
    %c0_i32_1 = arith.constant 0 : i32
    return %c0_i32, %c0_i32_0 : i32, i32
  }
  func.func @transform_5(%arg0: i32) -> (i32, i32) {
    %c0_i32 = arith.constant 0 : i32
    %c0_i32_0 = arith.constant 0 : i32
    %c0_i32_1 = arith.constant 0 : i32
    return %c0_i32, %c0_i32_0 : i32, i32
  }
  func.func @transform_6(%arg0: i32) -> (i32, i32) {
    %c0_i32 = arith.constant 0 : i32
    %c0_i32_0 = arith.constant 0 : i32
    %c0_i32_1 = arith.constant 0 : i32
    return %c0_i32, %c0_i32_0 : i32, i32
  }
  func.func @transform_7(%arg0: i32) -> (i32, i32) {
    %c0_i32 = arith.constant 0 : i32
    %c0_i32_0 = arith.constant 0 : i32
    return %arg0, %c0_i32 : i32, i32
  }
  func.func @transform_8(%arg0: i32) -> (i32, i32) {
    %c0_i32 = arith.constant 0 : i32
    %c0_i32_0 = arith.constant 0 : i32
    return %arg0, %c0_i32 : i32, i32
  }
}

</mosaic_0001>

<bundles_post_ra>
// kernel: actor_forward.1
= control target key start
LH: loop header
LB: loop body
LE: loop exit
PB: predicated region body
PF: predicated region fallthrough
CT: control target
= control target key end

     0   :  { %vm37_vm0 = vcmask 64512   ;;  %v347_v0 = vmov 0.0   ;;  %vm348_vm1 = vmmov 0   ;;  %vm123_vm2 = vcmask 261120   ;;  %s442_s1 = inlined_call_operand.vmem [shape: f32[8,32], index: 1, kind: input, shape index: {}]   ;;  %s443_s0 = inlined_call_operand.vmem [shape: f32[8,8], index: 0, kind: input, shape index: {}]   ;;  %s444_s3 = inlined_call_operand.vmem [shape: f32[32,32], index: 3, kind: input, shape index: {}]   ;;  %s445_s5 = inlined_call_operand.vmem [shape: f32[32,8], index: 5, kind: input, shape index: {}]   ;;  %s446_s2 = inlined_call_operand.vmem [shape: f32[1,32], index: 2, kind: input, shape index: {}]   ;;  %s447_s4 = inlined_call_operand.vmem [shape: f32[1,32], index: 4, kind: input, shape index: {}]   ;;  %s448_s6 = inlined_call_operand.vmem [shape: f32[1,8], index: 6, kind: input, shape index: {}]   ;;  %s449_s7 = inlined_call_operand.vmem [shape: f32[8,4], index: 7, kind: output, shape index: {0}]   ;;  %s450_s8 = inlined_call_operand.vmem [shape: f32[8,4], index: 8, kind: output, shape index: {1}]  }
   0x1   :  { %317 = vmatprep.subr.mxu0 %v347_v0  ;;  %v29_v1 = vld [vmem:[%s442_s1] sm:$0xff]  ;;  %319 = vmatprep.mubr.msk.f32.mxu0 %vm348_vm1, %v347_v0  ;;  %v115_v3 = vld [vmem:[%s444_s3 + $0x18] sm:$0xff]  ;;  %v114_v4 = vld [vmem:[%s444_s3 + $0x10] sm:$0xff]  ;;  %vm282_vm3 = vcmask 31744  }
   0x2   :  { %v28_v2 = vld [vmem:[%s443_s0] sm:$0xff]  ;;  %318 = vmatpush3.msra.mxu0 %v29_v1  ;;  %322 = vmatprep.subr.mxu1 %v347_v0  ;;  %v113_v5 = vld [vmem:[%s444_s3 + $0x8] sm:$0xff]  ;;  %v201_v7 = vld [vmem:[%s445_s5 + $0x18] sm:$0xff] }
   0x3   :  { %320 = vmatmul.mubr.msk.f32.vlgmr.msra.gmra.mxu0 %vm37_vm0, %v28_v2  ;;  %323 = vmatpush3.msra.mxu1 %v115_v3  ;;  %v112_v6 = vld [vmem:[%s444_s3] sm:$0xff]  ;;  %v200_v13 = vld [vmem:[%s445_s5 + $0x10] sm:$0xff]  ;;  %v199_v14 = vld [vmem:[%s445_s5 + $0x8] sm:$0xff] }
   0x4   :  { %324 = vmatprep.subr.mxu1 %v347_v0  ;;  %330 = vmatprep.mubr.msk.f32.mxu1 %vm348_vm1, %v347_v0  ;;  %v299_v8 = vld [vmem:[%s446_s2] ss:$0 sm:$0xff] }
   0x5   :  { %333 = vmatprep.subr.mxu0 %v347_v0  ;;  %341 = vmatprep.mubr.msk.f32.mxu0 %vm348_vm1, %v347_v0  ;;  %v198_v15 = vld [vmem:[%s445_s5] sm:$0xff] }
   0x6   :  { %325 = vmatpush3.msra.mxu1 %v114_v4  ;;  %334 = vmatpush3.msra.mxu0 %v201_v7  ;;  %v301_v16 = vld [vmem:[%s447_s4] ss:$0 sm:$0xff]  ;;  %s349_s4 = smov 124  }
   0x7   :  { %326 = vmatprep.subr.mxu1 %v347_v0  ;;  %335 = vmatprep.subr.mxu0 %v347_v0  ;;  %v303_v21 = vld [vmem:[%s448_s6] ss:$0 sm:$0xff] }
   0x8   :  { %327 = vmatpush3.msra.mxu1 %v113_v5  ;;  %336 = vmatpush3.msra.mxu0 %v200_v13 }
   0x9   :  { %328 = vmatprep.subr.mxu1 %v347_v0  ;;  %337 = vmatprep.subr.mxu0 %v347_v0 }
   0xa   :  { %329 = vmatpush3.msra.mxu1 %v112_v6  ;;  %338 = vmatpush3.msra.mxu0 %v199_v14 }
   0xb   :  { %339 = vmatprep.subr.mxu0 %v347_v0 }
   0xc   :  { %340 = vmatpush3.msra.mxu0 %v198_v15 }
  0xc3   :  { %v107_v9 = vpop.f32.mrf.mxu0 }
  0xc4   :  { %v108_v10 = vadd.f32 %v299_v8, %v107_v9 }
  0xc5   :  { %v321_v11 = vpop.f32.mrf.mxu0 }
  0xc6   :  { %v111_v12 = vmax.f32 %v108_v10, 0.0 }
  0xc8   :  { %331 = vmatmul.mubr.msk.f32.vlgmr.msra.gmra.mxu1 %vm123_vm2, %v111_v12 }
 0x188   :  { %v193_v17 = vpop.f32.mrf.mxu1 }
 0x189   :  { %v194_v18 = vadd.f32 %v301_v16, %v193_v17 }
 0x18a   :  { %v332_v19 = vpop.f32.mrf.mxu1 }
 0x18b   :  { %v197_v20 = vmax.f32 %v194_v18, 0.0 }
 0x18d   :  { %342 = vmatmul.mubr.msk.f32.vlgmr.msra.gmra.mxu0 %vm123_vm2, %v197_v20 }
 0x24d   :  { %v278_v22 = vpop.f32.mrf.mxu0 }
 0x24e   :  { %v279_v23 = vadd.f32 %v303_v21, %v278_v22 }
 0x24f   :  { %v343_v24 = vpop.f32.mrf.mxu0 }
 0x250   :  { %v284_v25 = vmax.f32 %v279_v23, 1e-06  ;;  %283 = vst.msk [vmem:[%s449_s7] sm:$0xff] %vm282_vm3, %v279_v23 }
 0x252   :  { %v285_v26 = vmin.f32 %v284_v25, 1.0 }
 0x254   :  { %287 = vrot.lane.b32.xlu0 %v285_v26, %s349_s4 }
 0x2c6   :  { %v288_v27 = vpop.permute.xlu0 %287 }
 0x2c7   :  { %290 = vst.msk [vmem:[%s450_s8] sm:$0xff] %vm282_vm3, %v288_v27 }

</bundles_post_ra>
